<compile_context>
chip_gen: v6e
topology: v6e:2x2x1
jax: 0.10.0
libtpu: 0.0.40
codegen_flags: <defaults>
</compile_context>

<pallas_src>
import functools

import jax
import jax.numpy as jnp
from jax.experimental import pallas as pl
from jax.experimental.pallas import tpu as pltpu

EPS = 1e-5  # PyTorch nn.LayerNorm default


# ----------------------------- kernels -------------------------------------

def layernorm_kernel(x_ref, scale_ref, o_ref, *, dim, dim_padded):
    """Row-resident LayerNorm tile. Two-pass moments in f32."""
    x = x_ref[...].astype(jnp.float32)                 # (tile_rows, dim_padded)
    inv_dim = 1.0 / dim
    # Wrapper zero-pads the feature axis, so sum(x) over padded lanes is exact.
    mean = jnp.sum(x, axis=-1, keepdims=True) * inv_dim
    xc = x - mean
    if dim != dim_padded:
        # Padded lanes must not contribute to the variance.
        lane = jax.lax.broadcasted_iota(jnp.int32, xc.shape, dimension=xc.ndim - 1)
        xc = jnp.where(lane < dim, xc, 0.0)
    var = jnp.sum(xc * xc, axis=-1, keepdims=True) * inv_dim
    inv_std = jax.lax.rsqrt(var + EPS)
    o_ref[...] = (xc * inv_std * scale_ref[...]).astype(o_ref.dtype)


def _stats_kernel(x_ref, s1_ref, s2_ref):
    """Huge-dim fallback, pass 1: accumulate sum(x), sum(x*x) over dim tiles."""
    @pl.when(pl.program_id(1) == 0)
    def _():
        s1_ref[...] = jnp.zeros_like(s1_ref)
        s2_ref[...] = jnp.zeros_like(s2_ref)
    x = x_ref[...].astype(jnp.float32)
    s1_ref[...] += jnp.sum(x, axis=-1, keepdims=True)
    s2_ref[...] += jnp.sum(x * x, axis=-1, keepdims=True)


def _normalize_kernel(x_ref, s1_ref, s2_ref, scale_ref, o_ref, *, inv_dim):
    """Huge-dim fallback, pass 2: normalize each dim tile with row moments."""
    x = x_ref[...].astype(jnp.float32)
    mean = s1_ref[...] * inv_dim
    var = jnp.maximum(s2_ref[...] * inv_dim - mean * mean, 0.0)
    inv_std = jax.lax.rsqrt(var + EPS)
    o_ref[...] = ((x - mean) * inv_std * scale_ref[...]).astype(o_ref.dtype)


# --------------------------- tiling helpers ---------------------------------

def _vmem_capacity_bytes():
    try:
        info = pltpu.get_tpu_info()
        cap = getattr(info, "vmem_capacity_bytes", None)
        if cap:
            return int(cap)
    except Exception:
        pass
    return 64 * 1024 * 1024  # conservative fallback: v7x has 64 MiB / TC


def _vmem_budgets():
    """(tile-sizing budget, vmem_limit_bytes) — generation-aware."""
    cap = _vmem_capacity_bytes()
    if cap >= 96 * 1024 * 1024:
        # v5e / v6e: 128 MiB VMEM — use big blocks, raise the scoped limit.
        return 48 * 1024 * 1024, 96 * 1024 * 1024
    # v7x: 64 MiB per TC — leave ~30% headroom for Mosaic internal scratch.
    return 18 * 1024 * 1024, 44 * 1024 * 1024


def _sublane(x_dtype, out_dtype):
    xb = jnp.dtype(x_dtype).itemsize
    ob = jnp.dtype(out_dtype).itemsize
    return max(8, 32 // min(xb, ob))


def _per_row_bytes(dim_padded, x_dtype, out_dtype):
    xb = jnp.dtype(x_dtype).itemsize
    ob = jnp.dtype(out_dtype).itemsize
    upcast = 4 if xb < 4 else 0  # full f32 copy of the tile materialized in-body
    # 2x input buf + 2x output buf (double buffering) + f32 upcast +
    # ~3 f32 row-wide temporaries (centered copy + reduction streams).
    return dim_padded * (2 * xb + 2 * ob + upcast + 3 * 4)


def _pick_tile_rows(rows, dim_padded, x_dtype, out_dtype, budget):
    """Largest sublane-multiple row tile fitting the VMEM budget, capped at
    ~ceil(rows/2) so the grid has >=2 steps (both v7x TensorCores get work).
    Returns None when even a minimal tile overflows the budget (huge dim)."""
    sub = _sublane(x_dtype, out_dtype)
    per_row = _per_row_bytes(dim_padded, x_dtype, out_dtype)
    tile = budget // per_row
    if tile < sub:
        return None
    tile = (tile // sub) * sub
    half_rows = ((((rows + 1) // 2) + sub - 1) // sub) * sub
    return int(max(min(tile, half_rows), sub))


# ------------------------------ wrappers ------------------------------------

def _layer_norm_dim_tiled(x2, scale, rows, dim, out_dtype, dim_tile,
                          budget, vmem_limit):
    """Fallback for feature dims too large for a single VMEM-resident tile:
    two pallas_calls (moment accumulation over dim tiles, then normalize)."""
    if dim_tile is None:
        dim_tile = 16 * 1024
    dim_tile = max(128, (int(dim_tile) // 128) * 128)
    width = x2.shape[1]                      # already a multiple of 128
    dim_tile = min(dim_tile, width)
    n_dt = -(-width // dim_tile)
    dim_padded = n_dt * dim_tile
    if dim_padded != width:
        x2 = jnp.pad(x2, ((0, 0), (0, dim_padded - width)))
        scale = jnp.pad(scale, ((0, 0), (0, dim_padded - width)))

    sub = _sublane(x2.dtype, out_dtype)
    per_row = _per_row_bytes(dim_tile, x2.dtype, out_dtype)
    tile_rows = max((budget // per_row) // sub * sub, sub)
    half_rows = ((((rows + 1) // 2) + sub - 1) // sub) * sub
    tile_rows = int(max(min(tile_rows, half_rows), sub))

    grid = (pl.cdiv(rows, tile_rows), n_dt)

    s1, s2 = pl.pallas_call(
        _stats_kernel,
        out_shape=(jax.ShapeDtypeStruct((rows, 1), jnp.float32),
                   jax.ShapeDtypeStruct((rows, 1), jnp.float32)),
        grid_spec=pltpu.PrefetchScalarGridSpec(
            num_scalar_prefetch=0,
            grid=grid,
            in_specs=[pl.BlockSpec((tile_rows, dim_tile), lambda i, j: (i, j))],
            out_specs=(pl.BlockSpec((tile_rows, 1), lambda i, j: (i, 0)),
                       pl.BlockSpec((tile_rows, 1), lambda i, j: (i, 0))),
        ),
        compiler_params=pltpu.CompilerParams(
            dimension_semantics=("parallel", "arbitrary"),
            vmem_limit_bytes=vmem_limit,
        ),
    )(x2)

    norm = functools.partial(_normalize_kernel, inv_dim=1.0 / dim)
    out = pl.pallas_call(
        norm,
        out_shape=jax.ShapeDtypeStruct((rows, dim_padded), out_dtype),
        grid_spec=pltpu.PrefetchScalarGridSpec(
            num_scalar_prefetch=0,
            grid=grid,
            in_specs=[
                pl.BlockSpec((tile_rows, dim_tile), lambda i, j: (i, j)),
                pl.BlockSpec((tile_rows, 1), lambda i, j: (i, 0)),
                pl.BlockSpec((tile_rows, 1), lambda i, j: (i, 0)),
                pl.BlockSpec((1, dim_tile), lambda i, j: (0, j)),
            ],
            out_specs=pl.BlockSpec((tile_rows, dim_tile), lambda i, j: (i, j)),
        ),
        compiler_params=pltpu.CompilerParams(
            dimension_semantics=("parallel", "parallel"),
            vmem_limit_bytes=vmem_limit,
        ),
    )(x2, s1, s2, scale)

    return out[:, :dim]


def layer_norm(x, gamma, *, tile_rows=None, dim_tile=None, force_dim_tiled=False):
    """x: (..., dim), gamma: (dim,). Returns LayerNorm(x) * (gamma + 1)."""
    # TODO(synk): the PyTorch forward also accepts a per-batch (b, dim) gamma
    # (dead branch for this module's own zeros(dim) Parameter); only the 1-D
    # gamma path is implemented here.
    orig_shape = x.shape
    dim = orig_shape[-1]
    x2 = x.reshape(-1, dim)
    rows = x2.shape[0]

    # gamma + 1 hoisted out of the per-grid-step body.
    scale = (gamma.astype(jnp.float32) + 1.0).reshape(1, dim)

    budget, vmem_limit = _vmem_budgets()

    # Lane-dense stores: zero-pad the feature axis to a multiple of 128 in the
    # wrapper instead of relying on masked vst.msk partial stores.
    dim_padded = ((dim + 127) // 128) * 128
    if dim_padded != dim:
        x2 = jnp.pad(x2, ((0, 0), (0, dim_padded - dim)))
        scale = jnp.pad(scale, ((0, 0), (0, dim_padded - dim)))

    picked = _pick_tile_rows(rows, dim_padded, x.dtype, x.dtype, budget)
    if force_dim_tiled or (tile_rows is None and picked is None):
        out = _layer_norm_dim_tiled(x2, scale, rows, dim, x.dtype, dim_tile,
                                    budget, vmem_limit)
        return out.reshape(orig_shape)

    if tile_rows is None:
        tile_rows = picked

    xb = jnp.dtype(x.dtype).itemsize
    cost = pl.CostEstimate(
        flops=8 * rows * dim,
        transcendentals=rows,                       # one rsqrt per row
        bytes_accessed=2 * rows * dim * xb + dim * 4,
    )

    kernel = functools.partial(layernorm_kernel, dim=dim, dim_padded=dim_padded)
    # NOTE: pipeline_mode=pl.Buffered(3) on the x input only if a profile shows
    # exposed DMA; default double buffering is kept to protect v7x's 64 MiB.
    out = pl.pallas_call(
        kernel,
        out_shape=jax.ShapeDtypeStruct((rows, dim_padded), x.dtype),
        grid_spec=pltpu.PrefetchScalarGridSpec(
            num_scalar_prefetch=0,
            grid=(pl.cdiv(rows, tile_rows),),
            in_specs=[
                pl.BlockSpec((tile_rows, dim_padded), lambda i: (i, 0)),
                pl.BlockSpec((1, dim_padded), lambda i: (0, 0)),
            ],
            out_specs=pl.BlockSpec((tile_rows, dim_padded), lambda i: (i, 0)),
        ),
        compiler_params=pltpu.CompilerParams(
            dimension_semantics=("parallel",),      # shards rows across v7x's 2 TCs
            vmem_limit_bytes=vmem_limit,
        ),
        cost_estimate=cost,
    )(x2, scale)

    if dim_padded != dim:
        out = out[:, :dim]
    return out.reshape(orig_shape)


# ------------------------------ reference -----------------------------------

def _reference(x, gamma):
    x32 = x.astype(jnp.float32)
    mean = jnp.mean(x32, axis=-1, keepdims=True)
    var = jnp.mean((x32 - mean) ** 2, axis=-1, keepdims=True)
    ref = (x32 - mean) / jnp.sqrt(var + EPS) * (gamma.astype(jnp.float32) + 1.0)
    return ref.astype(x.dtype)


if __name__ == "__main__":
    key = jax.random.PRNGKey(0)
    k1, k2, k3, k4, k5 = jax.random.split(key, 5)

    # Module-consistent small shape: (batch=2, seq=8, dim=128); gamma init = zeros.
    x = jax.random.normal(k1, (2, 8, 128), dtype=jnp.float32)
    gamma = jnp.zeros((128,), dtype=jnp.float32)
    out = layer_norm(x, gamma)
    jax.block_until_ready(out)
    assert jnp.allclose(out, _reference(x, gamma), atol=1e-5, rtol=1e-5), \
        "mismatch vs reference"

    # Non-zero gamma + partial last row tile (no padding on the row axis).
    gamma2 = 0.1 * jax.random.normal(k2, (128,), dtype=jnp.float32)
    x2 = jax.random.normal(k3, (3, 5, 128), dtype=jnp.float32)
    out2 = layer_norm(x2, gamma2)
    jax.block_until_ready(out2)
    assert jnp.allclose(out2, _reference(x2, gamma2), atol=1e-5, rtol=1e-5), \
        "mismatch vs reference (partial row tile)"

    # Feature dim not a multiple of 128 -> wrapper zero-pads, moments masked.
    x3 = jax.random.normal(k4, (2, 7, 96), dtype=jnp.float32)
    gamma3 = 0.1 * jax.random.normal(k5, (96,), dtype=jnp.float32)
    out3 = layer_norm(x3, gamma3)
    jax.block_until_ready(out3)
    assert jnp.allclose(out3, _reference(x3, gamma3), atol=1e-5, rtol=1e-5), \
        "mismatch vs reference (non-128 dim)"

    # bf16 activations (exercises the modeled f32 upcast in tile sizing).
    xb16 = jax.random.normal(k1, (2, 8, 128), dtype=jnp.bfloat16)
    outb = layer_norm(xb16, gamma2)
    jax.block_until_ready(outb)
    assert jnp.allclose(outb.astype(jnp.float32),
                        _reference(xb16, gamma2).astype(jnp.float32),
                        atol=5e-2, rtol=5e-2), "mismatch vs reference (bf16)"

    # Huge-dim fallback path, forced at a small size for correctness coverage.
    x4 = jax.random.normal(k3, (3, 5, 384), dtype=jnp.float32)
    gamma4 = 0.1 * jax.random.normal(k2, (384,), dtype=jnp.float32)
    out4 = layer_norm(x4, gamma4, force_dim_tiled=True, dim_tile=128)
    jax.block_until_ready(out4)
    assert jnp.allclose(out4, _reference(x4, gamma4), atol=1e-5, rtol=1e-5), \
        "mismatch vs reference (dim-tiled fallback)"

    print("KERNEL_OK")
</pallas_src>

<mosaic_0001>
module attributes {stable_mosaic.version = 11 : i64} {
  func.func @layernorm_kernel(%arg0: i32, %arg1: memref<8x128xf32, #tpu.memory_space<vmem>>, %arg2: memref<1x128xf32, #tpu.memory_space<vmem>>, %arg3: memref<8x128xf32, #tpu.memory_space<vmem>>) attributes {dimension_semantics = [#tpu.dimension_semantics<parallel>], iteration_bounds = array<i64: 2>, scalar_prefetch = 0 : i64, scratch_operands = 0 : i64, tpu.core_type = #tpu.core_type<tc>, window_params = [{transform_indices = @transform_0, window_bounds = array<i64: 8, 128>}, {pipeline_mode = #tpu.pipeline_mode<synchronous>, transform_indices = @transform_1, window_bounds = array<i64: 1, 128>}, {transform_indices = @transform_2, window_bounds = array<i64: 8, 128>}]} {
    %c0 = arith.constant 0 : index
    %c0_0 = arith.constant 0 : index
    %0 = vector.load %arg1[%c0, %c0_0] : memref<8x128xf32, #tpu.memory_space<vmem>>, vector<8x128xf32>
    %cst = arith.constant dense<0.000000e+00> : vector<8xf32>
    %1 = vector.multi_reduction <add>, %0, %cst [1] : vector<8x128xf32> to vector<8xf32>
    %2 = vector.shape_cast %1 : vector<8xf32> to vector<8x1xf32>
    %cst_1 = arith.constant 7.812500e-03 : f32
    %3 = vector.broadcast %cst_1 : f32 to vector<8x1xf32>
    %4 = arith.mulf %2, %3 : vector<8x1xf32>
    %5 = vector.broadcast %4 : vector<8x1xf32> to vector<8x128xf32>
    %6 = arith.subf %0, %5 : vector<8x128xf32>
    %7 = arith.mulf %6, %6 : vector<8x128xf32>
    %cst_2 = arith.constant dense<0.000000e+00> : vector<8xf32>
    %8 = vector.multi_reduction <add>, %7, %cst_2 [1] : vector<8x128xf32> to vector<8xf32>
    %9 = vector.shape_cast %8 : vector<8xf32> to vector<8x1xf32>
    %cst_3 = arith.constant 7.812500e-03 : f32
    %10 = vector.broadcast %cst_3 : f32 to vector<8x1xf32>
    %11 = arith.mulf %9, %10 : vector<8x1xf32>
    %cst_4 = arith.constant 9.99999974E-6 : f32
    %12 = vector.broadcast %cst_4 : f32 to vector<8x1xf32>
    %13 = arith.addf %11, %12 : vector<8x1xf32>
    %14 = math.rsqrt %13 : vector<8x1xf32>
    %15 = vector.broadcast %14 : vector<8x1xf32> to vector<8x128xf32>
    %16 = arith.mulf %6, %15 : vector<8x128xf32>
    %c0_5 = arith.constant 0 : index
    %c0_6 = arith.constant 0 : index
    %17 = vector.load %arg2[%c0_5, %c0_6] : memref<1x128xf32, #tpu.memory_space<vmem>>, vector<1x128xf32>
    %18 = vector.broadcast %17 : vector<1x128xf32> to vector<8x128xf32>
    %19 = arith.mulf %16, %18 : vector<8x128xf32>
    %c0_7 = arith.constant 0 : index
    %c0_8 = arith.constant 0 : index
    %20 = vector.load %arg3[%c0_7, %c0_8] : memref<8x128xf32, #tpu.memory_space<vmem>>, vector<8x128xf32>
    tpu.vector_store %arg3[%c0_7, %c0_8], %19 {strides = array<i32>} : memref<8x128xf32, #tpu.memory_space<vmem>>, vector<8x128xf32>,
    return
  }
  func.func @transform_0(%arg0: i32) -> (i32, i32) {
    %c0_i32 = arith.constant 0 : i32
    %c0_i32_0 = arith.constant 0 : i32
    return %arg0, %c0_i32 : i32, i32
  }
  func.func @transform_1(%arg0: i32) -> (i32, i32) {
    %c0_i32 = arith.constant 0 : i32
    %c0_i32_0 = arith.constant 0 : i32
    %c0_i32_1 = arith.constant 0 : i32
    return %c0_i32, %c0_i32_0 : i32, i32
  }
  func.func @transform_2(%arg0: i32) -> (i32, i32) {
    %c0_i32 = arith.constant 0 : i32
    %c0_i32_0 = arith.constant 0 : i32
    return %arg0, %c0_i32 : i32, i32
  }
}

</mosaic_0001>

<bundles_post_ra>
// kernel: tpu_custom_call.1
= control target key start
LH: loop header
LB: loop body
LE: loop exit
PB: predicated region body
PF: predicated region fallthrough
CT: control target
= control target key end

     0   :  { %7 = vsyncpa [#allocation3], 0  ;;  %s580_s0 = inlined_call_operand.hbm [shape: f32[16,128], index: 0, kind: input, shape index: {}]   ;;  %s581_s1 = inlined_call_operand.vmem [shape: f32[1,128], index: 1, kind: input, shape index: {}]   ;;  %s582_s2 = inlined_call_operand.hbm [shape: f32[16,128], index: 2, kind: output, shape index: {}]  }
   0x1   :  { %9 = vsyncpa [#allocation3 + $0x1], 0 }
   0x2   :  { %10 = vsyncpa [#allocation4], 0 }
   0x3   :  { %12 = vsyncpa [#allocation4 + $0x1], 0  ;;  %s436_s9 = smov 0   ;;  %s438_s10 = smov 0  }
   0x4   :  { %s440_s11 = smov 0   ;;  %s442_s12 = smov 0  }
   0x5 LB: > { %s457_s13 = sadd.s32 4294967295, %s417_s12   ;;  %s264_s14 = sadd.s32 4294967294, %s417_s12   ;;  %s417_s12 = sphi %s442_s12, %s599_s12   ;;  %s413_s11 = sphi %s440_s11, %s598_s11   ;;  %s409_s10 = sphi %s438_s10, %s597_s10   ;;  %s405_s9 = sphi %s436_s9, %s596_s9  }
   0x6   : > { %s461_s15 = sadd.s32 1, %s417_s12   ;;  %s25_s16 = sadd.s32 1, %s413_s11 }
   0x7   : > { %s22_s17 = ssub.s32 %s417_s12, %s461_s15  ;;  %p32_p0 = scmp.ne.s32.totalorder %s413_s11, %s409_s10 }
   0x8   : > { %p23_p1 = scmp.eq.s32.totalorder %s22_s17, 0  ;;  %p33_p2 = scmp.eq.s32.totalorder %s417_s12, 0 }
   0x9   : > { %p38_p3 = scmp.ne.s32.totalorder %s409_s10, %s405_s9  ;;  %p39_p4 = scmp.eq.s32.totalorder %s457_s13, 0 }
   0xa   : > { %s473_s18 = scalar_select %p23_p1, %s413_s11, %s25_s16  }
   0xb   : > { %p475_p5 = por %p33_p2, %p32_p0  ;;  %p479_p6 = por %p39_p4, %p38_p3 }
   0xc   : > { %p83_p7 = scmp.eq.s32.totalorder %s457_s13, 1  ;;  %p89_p8 = scmp.eq.s32.totalorder %s264_s14, 1 }
   0xd   : > { %s586_s20 = scalar_select %p479_p6, 1, 0 }
   0xe   : > { %p289_p10 = scmp.lt.s32.totalorder %s417_s12, 2  ;;  %p486_p11 = por %p83_p7, %p32_p0 }
   0xf   : > { %p490_p12 = por %p89_p8, %p38_p3  ;;  %s112_s23 = sand.u32 1, %s413_s11  }
  0x10   : > { %s587_s21 = scalar_select %p486_p11, 1, 0 }
  0x11   : > { %s588_s22 = scalar_select %p490_p12, 1, 0 }
  0x12   : > { %s268_s24 = sshll.u32 %s417_s12, 7  ;;  %s267_s25 = sshll.u32 %s112_s23, 3 }
  0x13   : > { %s499_s28 = scalar_lea.hbm %s580_s0, %s268_s24  ;;  %s116_s29 = scalar_lea.vmem [#allocation2], %s267_s25 }
  0x14   : > { %s123_s30 = sshll.u32 %s116_s29, 4  ;;  %p503_p13 = pnand %p289_p10, %p475_p5  ;;  %s507_s30 = int_to_ptr.vmem [resolvable:$true] %s123_s30 }
  0x15   : > { %s113_s4 = scalar_lea.sflag [#allocation3], %s112_s23  ;;  %s325_s5 = scalar_lea.hbm %s499_s28, 128 }
  0x16   : > { %p326_p2 = scmp.ne.s32.totalorder %s499_s28, %s325_s5  ;;  %p327_p3 = pneg %p503_p13 }
  0x17   : > { %s330_s8 = scalar_lea.hbm %s580_s0, 256  ;;  %p331_p5 = scmp.lt.s32.totalorder %s499_s28, %s580_s0 }
  0x18   : > { %p328_p4 = pnand %p327_p3, %p326_p2  ;;  %p332_p8 = scmp.lt.s32.totalorder %s330_s8, %s325_s5 }
  0x1a   : > { %p329_p7 = pneg %p328_p4  ;;  %p333_p10 = por %p332_p8, %p331_p5 }
  0x1c   : > { %p334_p9 = pnand %p333_p10, %p329_p7 }
  0x1e   : > { %337 = shalt.err (!%p334_p9)
}
  0x1f   : > { %s338_s17 = scalar_lea.vmem %s507_s30, 128  ;;  %s419_s19 = smov [#allocation2]  }
  0x20   : > { %p339_p0 = scmp.ne.s32.totalorder %s507_s30, %s338_s17  ;;  %s343_s23 = sshll.u32 %s419_s19, 4  ;;  %s344_s23 = int_to_ptr.vmem [resolvable:$false] %s343_s23 }
  0x21   : > { %s345_s24 = scalar_lea.vmem %s344_s23, 256  ;;  %p346_p4 = scmp.lt.s32.totalorder %s507_s30, %s344_s23 }
  0x22   : > { %p341_p1 = pnand %p339_p0, %p327_p3  ;;  %p347_p12 = scmp.lt.s32.totalorder %s345_s24, %s338_s17 }
  0x24   : > { %p342_p2 = pneg %p341_p1  ;;  %p348_p11 = por %p347_p12, %p346_p4 }
  0x26   : > { %p349_p6 = pnand %p348_p11, %p342_p2 }
  0x28   : > { %352 = shalt.err (!%p349_p6)
}
  0x29   : > { %284 = dma.hbm_to_vmem [thread:$0]  (!%p503_p13), %s499_s28, 128, %s507_s30, %s113_s4  }
  0x2a   : > { %p590_p9 = scmp.lt.s32.totalorder %s417_s12, 3  ;;  %p591_p7 = scmp.ge.s32.totalorder %s417_s12, 1 }
  0x2c   : > { %p129_p0 = pnand %p591_p7, %p590_p9 }
  0x2d   : > { %s534_s25 = sand.u32 (!%p129_p0), 1, %s409_s10   ;;  %p592_p6 = scmp.ne.s32.totalorder (!%p129_p0), %s586_s20, 0 }
  0x2e   : > { %132 = sbr.rel (%p129_p0) target bundleno = 370 (0x172), region = 28  ;;  %s270_s26 = sshll.u32 (!%p129_p0), %s534_s25, 3 }
  0x2f   : > { %s135_s27 = scalar_lea.sflag (!%p129_p0), [#allocation3], %s534_s25  ;;  %s138_s29 = scalar_lea.vmem (!%p129_p0), [#allocation2], %s270_s26 }
  0x33   : > { %396 = dma.done.wait (%p592_p6), %s135_s27, 128  }
  0x34   : > { %398 = vsyncadd (%p592_p6), %s135_s27, 4294967168  ;;  %v159_v0 = vld [vmem:[%s138_s29] sm:$0xff]  ;;  %s274_s20 = sshll.u32 %s457_s13, 7  ;;  %s158_s3 = scalar_lea.vmem [#allocation5], %s270_s26 }
  0x35   : > { %160 = vadd.xlane.f32.xlu0 %v159_v0  ;;  %v272_v9 = vld [vmem:[%s581_s1] ss:$0 sm:$0xff]  ;;  %s194_s4 = sshll.u32 %s158_s3, 4  ;;  %s192_s7 = scalar_lea.hbm %s582_s2, %s274_s20  ;;  %s195_s4 = int_to_ptr.vmem [resolvable:$true] %s194_s4 }
  0x36   : > { %s181_s8 = scalar_lea.sflag [#allocation4], %s534_s25  ;;  %s353_s14 = scalar_lea.vmem %s195_s4, 128 }
  0x37   : > { %p354_p11 = scmp.ne.s32.totalorder %s195_s4, %s353_s14  ;;  %p593_p12 = scmp.ne.s32.totalorder %s587_s21, 0 }
  0x38   : > { %s420_s16 = smov [#allocation5]  }
  0x39   : > { %p355_p13 = pnand %p354_p11, %p593_p12  ;;  %s357_s17 = sshll.u32 %s420_s16, 4  ;;  %s358_s17 = int_to_ptr.vmem [resolvable:$false] %s357_s17 }
  0x3a   : > { %s359_s13 = scalar_lea.vmem %s358_s17, 256  ;;  %p360_p3 = scmp.lt.s32.totalorder %s195_s4, %s358_s17 }
  0x3b   : > { %p356_p1 = pneg %p355_p13  ;;  %p361_p5 = scmp.lt.s32.totalorder %s359_s13, %s353_s14 }
  0x3d   : > { %p362_p8 = por %p361_p5, %p360_p3 }
  0x3f   : > { %p363_p10 = pnand %p362_p8, %p356_p1 }
  0xbe   : > { %v161_v1 = vpop.xlane.xlu0 %160 }
  0xbf   : > { %v162_v2 = vmul.f32 0.0078125, %v161_v1 }
  0xc1   : > { %v163_v3 = vsub.f32 %v159_v0, %v162_v2 }
  0xc3   : > { %v164_v4 = vmul.f32 %v163_v3, %v163_v3 }
  0xc5   : > { %165 = vadd.xlane.f32.xlu0 %v164_v4 }
 0x14e   : > { %v166_v5 = vpop.xlane.xlu0 %165 }
 0x14f   : > { %v167_v6 = vmul.f32 0.0078125, %v166_v5 }
 0x151   : > { %v168_v7 = vadd.f32 1e-05, %v167_v6 }
 0x153   : > { %323 = vrsqrt.f32 %v168_v7 }
 0x160   : > { %v324_v8 = vpop.eup %323 }
 0x161   : > { %v170_v10 = vmul.f32 %v324_v8, %v163_v3 }
 0x163   : > { %v178_v11 = vmul.f32 %v272_v9, %v170_v10 }
 0x165   : > { %179 = vst [vmem:[%s158_s3] sm:$0xff] %v178_v11 }
 0x166   : > { %366 = shalt.err (!%p363_p10)
}
 0x167   : > { %s367_s19 = scalar_lea.hbm %s192_s7, 128  ;;  %s371_s25 = scalar_lea.hbm %s582_s2, 256 }
 0x168   : > { %p368_p2 = scmp.ne.s32.totalorder %s192_s7, %s367_s19  ;;  %p372_p7 = scmp.lt.s32.totalorder %s192_s7, %s582_s2 }
 0x169   : > { %p373_p0 = scmp.lt.s32.totalorder %s371_s25, %s367_s19 }
 0x16a   : > { %p369_p4 = pnand %p368_p2, %p593_p12 }
 0x16b   : > { %p374_p6 = por %p373_p0, %p372_p7 }
 0x16c   : > { %p370_p9 = pneg %p369_p4 }
 0x16e   : > { %p375_p11 = pnand %p374_p6, %p370_p9 }
 0x170   : > { %378 = shalt.err (!%p375_p11)
}
 0x171   : > { %279 = dma.vmem_to_hbm [thread:$0]  (%p593_p12), %s195_s4, 128, %s192_s7, %s181_s8  }
 0x172 PF: > { %s206_s29 = sand.u32 1, %s405_s9   ;;  %p594_p13 = scmp.ne.s32.totalorder %s588_s22, 0 }
 0x173   : > { %p595_p1 = scmp.ge.s32.totalorder %s417_s12, 2  ;;  %s207_s28 = scalar_lea.sflag [#allocation4], %s206_s29 }
 0x175   : > { %p286_p3 = pnand %p595_p1, %p594_p13 }
 0x177   : > { %p287_p5 = pneg %p286_p3 }
 0x179   : > { %400 = dma.done.wait (%p287_p5), %s207_s28, 128  }
 0x17a   : > { %402 = vsyncadd (%p287_p5), %s207_s28, 4294967168  ;;  %p15_p8 = scmp.ge.s32.totalorder %s461_s15, 4   ;;  %s596_s9 = smov %s409_s10 }
 0x17b   : > { %s597_s10 = smov %s413_s11  ;;  %s598_s11 = smov %s473_s18 }
 0x17c   : > { %s599_s12 = smov %s461_s15  ;;  %17 = sbr.rel (!%p15_p8) target bundleno = 5 (0x5), region = 73 }
 0x181   :  { %212 = vsyncpa [#allocation3], 1 }
 0x182   :  { %214 = vsyncpa [#allocation3 + $0x1], 1 }
 0x183   :  { %215 = vsyncpa [#allocation4], 1 }
 0x184   :  { %217 = vsyncpa [#allocation4 + $0x1], 1 }

</bundles_post_ra>
